<compile_context>
chip_gen: v7x
topology: tpu7x:2x2x1
jax: 0.10.0
libtpu: 0.0.40
codegen_flags: <defaults>
</compile_context>

<pallas_src>
import functools

import jax
import jax.numpy as jnp
from jax.experimental import pallas as pl
from jax.experimental.pallas import tpu as pltpu

_LANE = 128    # TPU vreg lane width
_TB_MAX = 2048 # batch-tile cap


def _round_up(n, m):
    return ((n + m - 1) // m) * m


def _choose_batch_tile(batch):
    """Batch tile: multiple of 8 (sublane granularity), capped at 2048 so the
    ~0.35us per-grid-step overhead is amortized, and capped near batch/2 so the
    grid has >= 2 steps and dimension_semantics=("parallel",) can split the
    batch across v7x's two TensorCores."""
    if batch <= 8:
        return 8
    two_step = _round_up((batch + 1) // 2, 8)
    return min(two_step, _TB_MAX)


def _mlp_kernel(x_ref,
                w1_ref, b1_ref,
                w2_ref, b2_ref,
                w3_ref, b3_ref,
                w4_ref, b4_ref,
                out_ref, *, pack_output):
    cdt = w1_ref.dtype  # MXU operand dtype (bf16 by default)

    def linear_t(h, w_ref, b_ref):
        # y = h @ W^T + b with W stored PyTorch-style (out_features, in_features).
        # Contract both minor dims (the standard q@k^T MXU pattern); accumulate f32.
        y = jax.lax.dot_general(h, w_ref[...], (((1,), (1,)), ((), ())),
                                preferred_element_type=jnp.float32)
        return y + b_ref[...]

    # Linear(input_size, 100) + Tanh   (all widths padded to 128)
    h = jnp.tanh(linear_t(x_ref[...], w1_ref, b1_ref))          # (TB, 128) f32
    # Linear(100, 70) + ReLU
    h = jnp.maximum(linear_t(h.astype(cdt), w2_ref, b2_ref), 0.0)
    # Linear(70, 20) + ReLU
    h = jnp.maximum(linear_t(h.astype(cdt), w3_ref, b3_ref), 0.0)
    h = h.astype(cdt)

    if pack_output:
        # Final Linear(20, 1): compute the result already transposed,
        # r[o, j] = sum_k W4[o, k] * h[j, k]  -> (out_pad, TB).
        # Row 0 is the real output, lane-dense over the batch -> (1, TB) store.
        r = jax.lax.dot_general(w4_ref[...], h, (((1,), (1,)), ((), ())),
                                preferred_element_type=jnp.float32)
        out_ref[...] = (r[:1, :] + b4_ref[:1, :1]).astype(out_ref.dtype)
    else:
        # General output_size: lane-padded (TB, out_pad) store.
        y = linear_t(h, w4_ref, b4_ref)
        out_ref[...] = y.astype(out_ref.dtype)


def init_params(key, input_size, output_size, dtype=jnp.float32):
    """PyTorch nn.Linear-style init: U(-1/sqrt(fan_in), 1/sqrt(fan_in)) for
    weight and bias.  Weights stored PyTorch-style (out_features, in_features),
    biases (out_features,)."""
    sizes = [(input_size, 100), (100, 70), (70, 20), (20, output_size)]
    params = []
    for fan_in, fan_out in sizes:
        key, kw, kb = jax.random.split(key, 3)
        bound = 1.0 / (fan_in ** 0.5)
        w = jax.random.uniform(kw, (fan_out, fan_in), dtype, -bound, bound)
        b = jax.random.uniform(kb, (fan_out,), dtype, -bound, bound)
        params.append((w, b))
    return params


def pad_params(params, compute_dtype=jnp.bfloat16):
    """Zero-pad each layer's (out_features, in_features) weight and bias to
    multiples of 128.  Weights are cast to `compute_dtype` (bf16 by default:
    full-rate MXU path and half the DMA bytes); biases stay f32 (added after
    the f32 MXU accumulation).  Zero padding is exact through tanh/ReLU."""
    padded = []
    for w, b in params:
        fo, fi = w.shape
        fo_p, fi_p = _round_up(fo, _LANE), _round_up(fi, _LANE)
        w_p = jnp.zeros((fo_p, fi_p), compute_dtype).at[:fo, :fi].set(
            w.astype(compute_dtype))
        b_p = jnp.zeros((1, fo_p), jnp.float32).at[0, :fo].set(
            b.astype(jnp.float32))
        padded.append((w_p, b_p))
    return padded


def prepare_inputs(x, compute_dtype=jnp.bfloat16, batch_tile=None):
    """Pad the feature dim to 128 and the batch to a multiple of the batch
    tile, casting to the compute dtype.  Call ONCE per dataset / batch shape,
    outside the training loop, and reuse the result for every forward call."""
    B, D = x.shape
    TB = batch_tile or _choose_batch_tile(B)
    B_pad = _round_up(B, TB)
    D_pad = _round_up(D, _LANE)
    x_pad = jnp.zeros((B_pad, D_pad), compute_dtype).at[:B, :D].set(
        x.astype(compute_dtype))
    return x_pad, TB


@functools.partial(jax.jit,
                   static_argnames=("input_size", "output_size", "batch_tile"))
def _nn_forward_padded(x_pad, padded_flat, *, input_size, output_size,
                       batch_tile):
    B_pad, D_pad = x_pad.shape
    TB = batch_tile
    num_tiles = B_pad // TB
    pack_output = (output_size == 1)
    out_pad = padded_flat[-1].shape[1]  # padded output width (multiple of 128)

    # x is tiled over the batch; weights/biases use a constant index_map so
    # they stay VMEM-resident across all grid steps (no re-DMA per step).
    in_specs = [pl.BlockSpec((TB, D_pad), lambda i: (i, 0))]
    for arr in padded_flat:
        in_specs.append(pl.BlockSpec(arr.shape, lambda i: (0, 0)))

    if pack_output:
        # Packed, lane-dense output: (num_tiles, 1, TB) -> B_pad*4 bytes total.
        out_shape = jax.ShapeDtypeStruct((num_tiles, 1, TB), jnp.float32)
        out_spec = pl.BlockSpec((None, 1, TB), lambda i: (i, 0, 0))
        out_bytes = B_pad * 4
    else:
        out_shape = jax.ShapeDtypeStruct((B_pad, out_pad), jnp.float32)
        out_spec = pl.BlockSpec((TB, out_pad), lambda i: (i, 0))
        out_bytes = B_pad * out_pad * 4

    # True-FLOP cost estimate (unpadded math) as a scheduling hint.
    flops = 2 * B_pad * (input_size * 100 + 100 * 70 + 70 * 20
                         + 20 * output_size)
    bytes_accessed = (x_pad.size * x_pad.dtype.itemsize
                      + sum(a.size * a.dtype.itemsize for a in padded_flat)
                      + out_bytes)
    cost = pl.CostEstimate(flops=flops, transcendentals=B_pad * 100,
                           bytes_accessed=bytes_accessed)

    kernel = functools.partial(_mlp_kernel, pack_output=pack_output)
    return pl.pallas_call(
        kernel,
        out_shape=out_shape,
        grid=(num_tiles,),
        in_specs=in_specs,
        out_specs=out_spec,
        compiler_params=pltpu.CompilerParams(
            dimension_semantics=("parallel",)),
        cost_estimate=cost,
    )(x_pad, *padded_flat)


def nn_forward_prepared(x_pad, padded_params, batch, input_size, output_size,
                        batch_tile):
    """Forward pass on a pre-padded input (see prepare_inputs).  Returns the
    flattened output, matching `self.layers(x).flatten()`."""
    flat = tuple(a for wb in padded_params for a in wb)
    out = _nn_forward_padded(x_pad, flat, input_size=input_size,
                             output_size=output_size, batch_tile=batch_tile)
    if output_size == 1:
        return out.reshape(-1)[:batch]
    return out[:batch, :output_size].reshape(-1)


def nn_forward(x, padded_params, output_size):
    """Convenience one-shot forward.  For training loops, hoist
    prepare_inputs() out of the loop and call nn_forward_prepared instead."""
    B, D_in = x.shape
    x_pad, TB = prepare_inputs(x)
    return nn_forward_prepared(x_pad, padded_params, B, D_in, output_size, TB)


def _reference_forward(x, params):
    (w1, b1), (w2, b2), (w3, b3), (w4, b4) = params
    h = jnp.tanh(x @ w1.T + b1)
    h = jnp.maximum(h @ w2.T + b2, 0.0)
    h = jnp.maximum(h @ w3.T + b3, 0.0)
    return (h @ w4.T + b4).reshape(-1)


if __name__ == "__main__":
    key = jax.random.PRNGKey(0)
    input_size = 13       # housing-style feature count
    output_size = 1
    batch = 8

    kx, kp = jax.random.split(key)
    x = jax.random.normal(kx, (batch, input_size), dtype=jnp.float32)
    params = init_params(kp, input_size, output_size)

    # One-time prep (outside any training loop): pad/cast weights and inputs.
    padded_params = pad_params(params)           # bf16 weights, f32 biases
    x_pad, tb = prepare_inputs(x)                 # bf16, feature dim -> 128

    y = nn_forward_prepared(x_pad, padded_params, batch, input_size,
                            output_size, tb)
    y = jax.block_until_ready(y)

    y_ref = _reference_forward(x, params)         # f32 reference
    assert y.shape == (batch * output_size,)
    # bf16 operands (intentional perf tradeoff) -> loose tolerance vs f32 ref.
    assert jnp.allclose(y, y_ref, atol=5e-2, rtol=5e-2)

    print("KERNEL_OK")
</pallas_src>

<mosaic_0001>
module attributes {stable_mosaic.version = 11 : i64} {
  func.func @_mlp_kernel(%arg0: i32, %arg1: memref<8x128xbf16, #tpu.memory_space<vmem>>, %arg2: memref<128x128xbf16, #tpu.memory_space<vmem>>, %arg3: memref<1x128xf32, #tpu.memory_space<vmem>>, %arg4: memref<128x128xbf16, #tpu.memory_space<vmem>>, %arg5: memref<1x128xf32, #tpu.memory_space<vmem>>, %arg6: memref<128x128xbf16, #tpu.memory_space<vmem>>, %arg7: memref<1x128xf32, #tpu.memory_space<vmem>>, %arg8: memref<128x128xbf16, #tpu.memory_space<vmem>>, %arg9: memref<1x128xf32, #tpu.memory_space<vmem>>, %arg10: memref<1x1x8xf32, #tpu.memory_space<vmem>>) attributes {dimension_semantics = [#tpu.dimension_semantics<parallel>], iteration_bounds = array<i64: 1>, scalar_prefetch = 0 : i64, scratch_operands = 0 : i64, tpu.core_type = #tpu.core_type<tc>, window_params = [{transform_indices = @transform_0, window_bounds = array<i64: 8, 128>}, {pipeline_mode = #tpu.pipeline_mode<synchronous>, transform_indices = @transform_1, window_bounds = array<i64: 128, 128>}, {pipeline_mode = #tpu.pipeline_mode<synchronous>, transform_indices = @transform_2, window_bounds = array<i64: 1, 128>}, {pipeline_mode = #tpu.pipeline_mode<synchronous>, transform_indices = @transform_3, window_bounds = array<i64: 128, 128>}, {pipeline_mode = #tpu.pipeline_mode<synchronous>, transform_indices = @transform_4, window_bounds = array<i64: 1, 128>}, {pipeline_mode = #tpu.pipeline_mode<synchronous>, transform_indices = @transform_5, window_bounds = array<i64: 128, 128>}, {pipeline_mode = #tpu.pipeline_mode<synchronous>, transform_indices = @transform_6, window_bounds = array<i64: 1, 128>}, {pipeline_mode = #tpu.pipeline_mode<synchronous>, transform_indices = @transform_7, window_bounds = array<i64: 128, 128>}, {pipeline_mode = #tpu.pipeline_mode<synchronous>, transform_indices = @transform_8, window_bounds = array<i64: 1, 128>}, {transform_indices = @transform_9, window_bounds = array<i64: 1, 1, 8>}]} {
    %c0 = arith.constant 0 : index
    %c0_0 = arith.constant 0 : index
    %0 = vector.load %arg1[%c0, %c0_0] : memref<8x128xbf16, #tpu.memory_space<vmem>>, vector<8x128xbf16>
    %c0_1 = arith.constant 0 : index
    %c0_2 = arith.constant 0 : index
    %1 = vector.load %arg2[%c0_1, %c0_2] : memref<128x128xbf16, #tpu.memory_space<vmem>>, vector<128x128xbf16>
    %cst = arith.constant dense<0.000000e+00> : vector<8x128xf32>
    %2 = tpu.matmul %0, %1, %cst {dimension_numbers = #tpu.dot_dimension_numbers<[1], [1], [0], [0], [0, 0, 1, 0], [], []>} : vector<8x128xbf16>, vector<128x128xbf16>, vector<8x128xf32> -> vector<8x128xf32>
    %c0_3 = arith.constant 0 : index
    %c0_4 = arith.constant 0 : index
    %3 = vector.load %arg3[%c0_3, %c0_4] : memref<1x128xf32, #tpu.memory_space<vmem>>, vector<1x128xf32>
    %4 = vector.broadcast %3 : vector<1x128xf32> to vector<8x128xf32>
    %5 = arith.addf %2, %4 : vector<8x128xf32>
    %6 = math.tanh %5 : vector<8x128xf32>
    %7 = arith.truncf %6 : vector<8x128xf32> to vector<8x128xbf16>
    %c0_5 = arith.constant 0 : index
    %c0_6 = arith.constant 0 : index
    %8 = vector.load %arg4[%c0_5, %c0_6] : memref<128x128xbf16, #tpu.memory_space<vmem>>, vector<128x128xbf16>
    %cst_7 = arith.constant dense<0.000000e+00> : vector<8x128xf32>
    %9 = tpu.matmul %7, %8, %cst_7 {dimension_numbers = #tpu.dot_dimension_numbers<[1], [1], [0], [0], [0, 0, 1, 0], [], []>} : vector<8x128xbf16>, vector<128x128xbf16>, vector<8x128xf32> -> vector<8x128xf32>
    %c0_8 = arith.constant 0 : index
    %c0_9 = arith.constant 0 : index
    %10 = vector.load %arg5[%c0_8, %c0_9] : memref<1x128xf32, #tpu.memory_space<vmem>>, vector<1x128xf32>
    %11 = vector.broadcast %10 : vector<1x128xf32> to vector<8x128xf32>
    %12 = arith.addf %9, %11 : vector<8x128xf32>
    %cst_10 = arith.constant 0.000000e+00 : f32
    %13 = vector.broadcast %cst_10 : f32 to vector<8x128xf32>
    %14 = arith.maximumf %12, %13 : vector<8x128xf32>
    %15 = arith.truncf %14 : vector<8x128xf32> to vector<8x128xbf16>
    %c0_11 = arith.constant 0 : index
    %c0_12 = arith.constant 0 : index
    %16 = vector.load %arg6[%c0_11, %c0_12] : memref<128x128xbf16, #tpu.memory_space<vmem>>, vector<128x128xbf16>
    %cst_13 = arith.constant dense<0.000000e+00> : vector<8x128xf32>
    %17 = tpu.matmul %15, %16, %cst_13 {dimension_numbers = #tpu.dot_dimension_numbers<[1], [1], [0], [0], [0, 0, 1, 0], [], []>} : vector<8x128xbf16>, vector<128x128xbf16>, vector<8x128xf32> -> vector<8x128xf32>
    %c0_14 = arith.constant 0 : index
    %c0_15 = arith.constant 0 : index
    %18 = vector.load %arg7[%c0_14, %c0_15] : memref<1x128xf32, #tpu.memory_space<vmem>>, vector<1x128xf32>
    %19 = vector.broadcast %18 : vector<1x128xf32> to vector<8x128xf32>
    %20 = arith.addf %17, %19 : vector<8x128xf32>
    %cst_16 = arith.constant 0.000000e+00 : f32
    %21 = vector.broadcast %cst_16 : f32 to vector<8x128xf32>
    %22 = arith.maximumf %20, %21 : vector<8x128xf32>
    %23 = arith.truncf %22 : vector<8x128xf32> to vector<8x128xbf16>
    %c0_17 = arith.constant 0 : index
    %c0_18 = arith.constant 0 : index
    %24 = vector.load %arg8[%c0_17, %c0_18] : memref<128x128xbf16, #tpu.memory_space<vmem>>, vector<128x128xbf16>
    %cst_19 = arith.constant dense<0.000000e+00> : vector<128x8xf32>
    %25 = tpu.matmul %24, %23, %cst_19 {dimension_numbers = #tpu.dot_dimension_numbers<[1], [1], [0], [0], [0, 0, 1, 0], [], []>} : vector<128x128xbf16>, vector<8x128xbf16>, vector<128x8xf32> -> vector<128x8xf32>
    %26 = vector.extract_strided_slice %25 {offsets = [0, 0], sizes = [1, 8], strides = [1, 1]} : vector<128x8xf32> to vector<1x8xf32>
    %c0_20 = arith.constant 0 : index
    %c0_21 = arith.constant 0 : index
    %27 = vector.load %arg9[%c0_20, %c0_21] : memref<1x128xf32, #tpu.memory_space<vmem>>, vector<1x1xf32>
    %28 = vector.broadcast %27 : vector<1x1xf32> to vector<1x8xf32>
    %29 = arith.addf %26, %28 : vector<1x8xf32>
    %c0_22 = arith.constant 0 : index
    %c0_23 = arith.constant 0 : index
    %c0_24 = arith.constant 0 : index
    %30 = vector.load %arg10[%c0_22, %c0_23, %c0_24] : memref<1x1x8xf32, #tpu.memory_space<vmem>>, vector<1x1x8xf32>
    %31 = vector.shape_cast %30 : vector<1x1x8xf32> to vector<1x8xf32>
    %32 = vector.shape_cast %29 : vector<1x8xf32> to vector<1x1x8xf32>
    tpu.vector_store %arg10[%c0_22, %c0_23, %c0_24], %32 {strides = array<i32>} : memref<1x1x8xf32, #tpu.memory_space<vmem>>, vector<1x1x8xf32>,
    return
  }
  func.func @transform_0(%arg0: i32) -> (i32, i32) {
    %c0_i32 = arith.constant 0 : i32
    %c0_i32_0 = arith.constant 0 : i32
    return %arg0, %c0_i32 : i32, i32
  }
  func.func @transform_1(%arg0: i32) -> (i32, i32) {
    %c0_i32 = arith.constant 0 : i32
    %c0_i32_0 = arith.constant 0 : i32
    %c0_i32_1 = arith.constant 0 : i32
    return %c0_i32, %c0_i32_0 : i32, i32
  }
  func.func @transform_2(%arg0: i32) -> (i32, i32) {
    %c0_i32 = arith.constant 0 : i32
    %c0_i32_0 = arith.constant 0 : i32
    %c0_i32_1 = arith.constant 0 : i32
    return %c0_i32, %c0_i32_0 : i32, i32
  }
  func.func @transform_3(%arg0: i32) -> (i32, i32) {
    %c0_i32 = arith.constant 0 : i32
    %c0_i32_0 = arith.constant 0 : i32
    %c0_i32_1 = arith.constant 0 : i32
    return %c0_i32, %c0_i32_0 : i32, i32
  }
  func.func @transform_4(%arg0: i32) -> (i32, i32) {
    %c0_i32 = arith.constant 0 : i32
    %c0_i32_0 = arith.constant 0 : i32
    %c0_i32_1 = arith.constant 0 : i32
    return %c0_i32, %c0_i32_0 : i32, i32
  }
  func.func @transform_5(%arg0: i32) -> (i32, i32) {
    %c0_i32 = arith.constant 0 : i32
    %c0_i32_0 = arith.constant 0 : i32
    %c0_i32_1 = arith.constant 0 : i32
    return %c0_i32, %c0_i32_0 : i32, i32
  }
  func.func @transform_6(%arg0: i32) -> (i32, i32) {
    %c0_i32 = arith.constant 0 : i32
    %c0_i32_0 = arith.constant 0 : i32
    %c0_i32_1 = arith.constant 0 : i32
    return %c0_i32, %c0_i32_0 : i32, i32
  }
  func.func @transform_7(%arg0: i32) -> (i32, i32) {
    %c0_i32 = arith.constant 0 : i32
    %c0_i32_0 = arith.constant 0 : i32
    %c0_i32_1 = arith.constant 0 : i32
    return %c0_i32, %c0_i32_0 : i32, i32
  }
  func.func @transform_8(%arg0: i32) -> (i32, i32) {
    %c0_i32 = arith.constant 0 : i32
    %c0_i32_0 = arith.constant 0 : i32
    %c0_i32_1 = arith.constant 0 : i32
    return %c0_i32, %c0_i32_0 : i32, i32
  }
  func.func @transform_9(%arg0: i32) -> (i32, i32, i32) {
    %c0_i32 = arith.constant 0 : i32
    %c0_i32_0 = arith.constant 0 : i32
    %c0_i32_1 = arith.constant 0 : i32
    return %arg0, %c0_i32, %c0_i32_0 : i32, i32, i32
  }
}

</mosaic_0001>

<bundles_post_ra>
// kernel: _nn_forward_padded.1
= control target key start
LH: loop header
LB: loop body
LE: loop exit
PB: predicated region body
PF: predicated region fallthrough
CT: control target
= control target key end

     0   :  { %14 = vsyncpa [#allocation3], 0  ;;  %s1138_s0 = inlined_call_operand.hbm [shape: bf16[8,128], index: 0, kind: input, shape index: {}]   ;;  %s1139_s1 = inlined_call_operand.hbm [shape: bf16[128,128], index: 1, kind: input, shape index: {}]   ;;  %s1140_s2 = inlined_call_operand.vmem [shape: f32[1,128], index: 2, kind: input, shape index: {}]   ;;  %s1141_s3 = inlined_call_operand.hbm [shape: bf16[128,128], index: 3, kind: input, shape index: {}]   ;;  %s1142_s4 = inlined_call_operand.vmem [shape: f32[1,128], index: 4, kind: input, shape index: {}]   ;;  %s1143_s5 = inlined_call_operand.hbm [shape: bf16[128,128], index: 5, kind: input, shape index: {}]   ;;  %s1144_s6 = inlined_call_operand.vmem [shape: f32[1,128], index: 6, kind: input, shape index: {}]   ;;  %s1145_s7 = inlined_call_operand.hbm [shape: bf16[128,128], index: 7, kind: input, shape index: {}]   ;;  %s1146_s8 = inlined_call_operand.vmem [shape: f32[1,128], index: 8, kind: input, shape index: {}]   ;;  %s1147_s9 = inlined_call_operand.hbm [shape: f32[1,1,8], index: 9, kind: output, shape index: {}]  }
   0x1   :  { %15 = vsyncpa [#allocation6], 0 }
   0x2   :  { %16 = vsyncpa [#allocation9], 0 }
   0x3   :  { %17 = vsyncpa [#allocation4], 0  ;;  %s951_s30 = smov [#allocation5]   ;;  %s811_s13 = scalar_lea.hbm %s1139_s1, 1024 }
   0x4   :  { %s33_s10 = sshll.u32 %s951_s30, 4  ;;  %p812_p0 = scmp.ne.s32.totalorder %s1139_s1, %s811_s13  ;;  %s34_s10 = int_to_ptr.vmem [resolvable:$true] %s33_s10 }
   0x5   :  { %p815_p1 = scmp.lt.u32.totalorder %s811_s13, %s1139_s1 }
   0x7   :  { %p817_p2 = pnand %p815_p1, %p812_p0 }
   0x9   :  { %820 = shalt.err (!%p817_p2)
}
   0xa   :  { %s821_s18 = scalar_lea.vmem %s34_s10, 1024  ;;  %p826_p4 = scmp.lt.s32.totalorder %s34_s10, %s34_s10 }
   0xb   :  { %p822_p3 = scmp.ne.s32.totalorder %s34_s10, %s821_s18  ;;  %p827_p5 = scmp.lt.s32.totalorder %s821_s18, %s821_s18 }
   0xd   :  { %p828_p6 = por %p827_p5, %p826_p4 }
   0xf   :  { %p829_p7 = pnand %p828_p6, %p822_p3 }
  0x11   :  { %832 = shalt.err (!%p829_p7)
}
  0x12   :  { %s952_s19 = smov 64   ;;  %s953_s20 = smov 4  }
  0x13   :  { %39 = dma.hbm_to_vmem [thread:$0]  %s1139_s1, 1024, %s34_s10, [#allocation6], %s952_s19, %s952_s19, %s953_s20  }
  0x14   :  { %s954_s23 = smov [#allocation8]   ;;  %s955_s25 = smov [#allocation2]  }
  0x15   :  { %s61_s24 = sshll.u32 %s954_s23, 4  ;;  %s24_s26 = sshll.u32 %s955_s25, 4  ;;  %s62_s24 = int_to_ptr.vmem [resolvable:$true] %s61_s24  ;;  %s25_s26 = int_to_ptr.vmem [resolvable:$true] %s24_s26 }
  0x16   :  { %s833_s29 = scalar_lea.hbm %s1143_s5, 1024 }
  0x17   :  { %p834_p8 = scmp.ne.s32.totalorder %s1143_s5, %s833_s29  ;;  %p837_p9 = scmp.lt.u32.totalorder %s833_s29, %s1143_s5 }
  0x19   :  { %p839_p10 = pnand %p837_p9, %p834_p8 }
  0x1b   :  { %842 = shalt.err (!%p839_p10)
}
  0x1c   :  { %s843_s1 = scalar_lea.vmem %s62_s24, 1024  ;;  %p848_p12 = scmp.lt.s32.totalorder %s62_s24, %s62_s24 }
  0x1d   :  { %p844_p11 = scmp.ne.s32.totalorder %s62_s24, %s843_s1  ;;  %p849_p13 = scmp.lt.s32.totalorder %s843_s1, %s843_s1 }
  0x1f   :  { %p850_p0 = por %p849_p13, %p848_p12 }
  0x21   :  { %p851_p1 = pnand %p850_p0, %p844_p11 }
  0x23   :  { %854 = shalt.err (!%p851_p1)
}
  0x24   :  { %67 = dma.hbm_to_vmem [thread:$0]  %s1143_s5, 1024, %s62_s24, [#allocation9], %s952_s19, %s952_s19, %s953_s20  }
  0x25   :  { %s855_s17 = scalar_lea.hbm %s1138_s0, 64 }
  0x26   :  { %p856_p2 = scmp.ne.s32.totalorder %s1138_s0, %s855_s17  ;;  %p859_p3 = scmp.lt.u32.totalorder %s855_s17, %s1138_s0 }
  0x28   :  { %p861_p4 = pnand %p859_p3, %p856_p2 }
  0x2a   :  { %864 = shalt.err (!%p861_p4)
}
  0x2b   :  { %s865_s25 = scalar_lea.vmem %s25_s26, 64  ;;  %p870_p6 = scmp.lt.s32.totalorder %s25_s26, %s25_s26 }
  0x2c   :  { %p866_p5 = scmp.ne.s32.totalorder %s25_s26, %s865_s25  ;;  %p871_p7 = scmp.lt.s32.totalorder %s865_s25, %s865_s25 }
  0x2e   :  { %p872_p8 = por %p871_p7, %p870_p6 }
  0x30   :  { %p873_p9 = pnand %p872_p8, %p866_p5 }
  0x32   :  { %876 = shalt.err (!%p873_p9)
}
  0x33   :  { %27 = dma.hbm_to_vmem [thread:$0]  %s1138_s0, 64, %s25_s26, [#allocation3]  }
  0x34   :  { %s956_s27 = smov [#allocation7]   ;;  %s957_s29 = smov [#allocation10]  }
  0x35   :  { %s47_s28 = sshll.u32 %s956_s27, 4  ;;  %s75_s30 = sshll.u32 %s957_s29, 4  ;;  %s48_s28 = int_to_ptr.vmem [resolvable:$true] %s47_s28  ;;  %s76_s30 = int_to_ptr.vmem [resolvable:$true] %s75_s30 }
  0x36   :  { %s877_s13 = scalar_lea.hbm %s1141_s3, 1024 }
  0x37   :  { %p878_p10 = scmp.ne.s32.totalorder %s1141_s3, %s877_s13  ;;  %p881_p11 = scmp.lt.u32.totalorder %s877_s13, %s1141_s3 }
  0x39   :  { %p883_p12 = pnand %p881_p11, %p878_p10 }
  0x3b   :  { %886 = shalt.err (!%p883_p12)
}
  0x3c   :  { %s887_s0 = scalar_lea.vmem %s48_s28, 1024  ;;  %p892_p0 = scmp.lt.s32.totalorder %s48_s28, %s48_s28 }
  0x3d   :  { %p888_p13 = scmp.ne.s32.totalorder %s48_s28, %s887_s0  ;;  %p893_p1 = scmp.lt.s32.totalorder %s887_s0, %s887_s0 }
  0x3f   :  { %p894_p2 = por %p893_p1, %p892_p0 }
  0x41   :  { %p895_p3 = pnand %p894_p2, %p888_p13 }
  0x43   :  { %898 = shalt.err (!%p895_p3)
}
  0x44   :  { %53 = dma.hbm_to_vmem [thread:$0]  %s1141_s3, 1024, %s48_s28, [#allocation6], %s952_s19, %s952_s19, %s953_s20  }
  0x45   :  { %s899_s21 = scalar_lea.hbm %s1145_s7, 1024 }
  0x46   :  { %p900_p4 = scmp.ne.s32.totalorder %s1145_s7, %s899_s21  ;;  %p903_p5 = scmp.lt.u32.totalorder %s899_s21, %s1145_s7 }
  0x48   :  { %p905_p6 = pnand %p903_p5, %p900_p4 }
  0x4a   :  { %908 = shalt.err (!%p905_p6)
}
  0x4b   :  { %s909_s24 = scalar_lea.vmem %s76_s30, 1024  ;;  %p914_p8 = scmp.lt.s32.totalorder %s76_s30, %s76_s30 }
  0x4c   :  { %p910_p7 = scmp.ne.s32.totalorder %s76_s30, %s909_s24  ;;  %p915_p9 = scmp.lt.s32.totalorder %s909_s24, %s909_s24 }
  0x4e   :  { %p916_p10 = por %p915_p9, %p914_p8 }
  0x50   :  { %p917_p11 = pnand %p916_p10, %p910_p7 }
  0x52   :  { %920 = shalt.err (!%p917_p11)
}
  0x53   :  { %81 = dma.hbm_to_vmem [thread:$0]  %s1145_s7, 1024, %s76_s30, [#allocation9], %s952_s19, %s952_s19, %s953_s20  }
  0x54   :  { %943 = dma.done.wait [#allocation3], 64  }
  0x55   :  { %944 = vsyncadd [#allocation3], 4294967232 }
  0x56   :  { %945 = dma.done.wait [#allocation6], 2048  }
  0x57   :  { %946 = vsyncadd [#allocation6], 4294965248 }
  0x58   :  { %947 = dma.done.wait [#allocation9], 2048  }
  0x59   :  { %948 = vsyncadd [#allocation9], 4294965248  ;;  %v958_v0 = vmov 0.0   ;;  %vm959_vm0 = vmmov 0   ;;  %v777_v1 = vld [vmem:[#allocation5] sm:$0xff]   ;;  %v778_v2 = vld [vmem:[#allocation5 + $0x8] sm:$0xff]   ;;  %v592_v60 = vlaneseq }
  0x5a   :  { %687 = vmatprep.subr.bf16.mxu0 %v958_v0  ;;  %703 = vmatprep.mubr.msk.bf16.mxu0 %vm959_vm0, %v958_v0  ;;  %v785_v3 = vld [vmem:[#allocation7] sm:$0xff]   ;;  %v779_v4 = vld [vmem:[#allocation5 + $0x10] sm:$0xff]   ;;  %v786_v5 = vld [vmem:[#allocation7 + $0x8] sm:$0xff]   ;;  %v960_v44 = vmov 0   ;;  %vm597_vm1 = vcmask 57344  }
  0x5b   :  { %707 = vmatprep.subr.bf16.mxu1 %v958_v0  ;;  %723 = vmatprep.mubr.msk.bf16.mxu1 %vm959_vm0, %v958_v0  ;;  %v780_v6 = vld [vmem:[#allocation5 + $0x18] sm:$0xff]   ;;  %v787_v7 = vld [vmem:[#allocation7 + $0x10] sm:$0xff]   ;;  %v781_v8 = vld [vmem:[#allocation5 + $0x20] sm:$0xff]   ;;  %v593_v61 = vshrl.u32 %v592_v60, 7 }
  0x5c   :  { %688 = vmatpush3.bf16.xpose.msra.mxu0 %v777_v1  ;;  %708 = vmatpush3.bf16.xpose.msra.mxu1 %v785_v3  ;;  %v788_v9 = vld [vmem:[#allocation7 + $0x18] sm:$0xff]   ;;  %v782_v10 = vld [vmem:[#allocation5 + $0x28] sm:$0xff]   ;;  %v789_v11 = vld [vmem:[#allocation7 + $0x20] sm:$0xff]  }
  0x5d   :  { %689 = vmatprep.subr.bf16.mxu0 %v958_v0  ;;  %709 = vmatprep.subr.bf16.mxu1 %v958_v0  ;;  %v783_v12 = vld [vmem:[#allocation5 + $0x30] sm:$0xff]   ;;  %v790_v13 = vld [vmem:[#allocation7 + $0x28] sm:$0xff]   ;;  %v784_v14 = vld [vmem:[#allocation5 + $0x38] sm:$0xff]   ;;  %v594_v62 = vsub.s32 0, %v593_v61 }
  0x5e   :  { %v100_v15 = vld [vmem:[#allocation2] sm:$0xf]  ;;  %v791_v16 = vld [vmem:[#allocation7 + $0x30] sm:$0xff]   ;;  %v793_v18 = vld [vmem:[#allocation8] sm:$0xff]   ;;  %776 = vset.pattern.permute.xlu0 %v960_v44 }
  0x5f   :  { %v792_v17 = vld [vmem:[#allocation7 + $0x38] sm:$0xff]   ;;  %v794_v19 = vld [vmem:[#allocation8 + $0x8] sm:$0xff]   ;;  %v795_v20 = vld [vmem:[#allocation8 + $0x10] sm:$0xff]  }
  0x60   :  { %v796_v21 = vld [vmem:[#allocation8 + $0x18] sm:$0xff]   ;;  %v797_v22 = vld [vmem:[#allocation8 + $0x20] sm:$0xff]   ;;  %v798_v23 = vld [vmem:[#allocation8 + $0x28] sm:$0xff]  }
  0x61   :  { %v799_v24 = vld [vmem:[#allocation8 + $0x30] sm:$0xff]   ;;  %v616_v25 = vld [vmem:[%s1140_s2] ss:$0 sm:$0xff]  ;;  %v801_v42 = vld [vmem:[#allocation10] sm:$0xff]  }
  0x62   :  { %v800_v33 = vld [vmem:[#allocation8 + $0x38] sm:$0xff]   ;;  %v802_v53 = vld [vmem:[#allocation10 + $0x8] sm:$0xff]   ;;  %v803_v54 = vld [vmem:[#allocation10 + $0x10] sm:$0xff]  }
  0x63   :  { %v625_v34 = vld [vmem:[%s1142_s4] ss:$0 sm:$0xff]  ;;  %v805_v56 = vld [vmem:[#allocation10 + $0x20] sm:$0xff]   ;;  %v806_v57 = vld [vmem:[#allocation10 + $0x28] sm:$0xff]   ;;  %s961_s4 = smov [#allocation11]  }
  0x64   :  { %690 = vmatpush3.bf16.xpose.msra.mxu0 %v778_v2  ;;  %710 = vmatpush3.bf16.xpose.msra.mxu1 %v786_v5  ;;  %v586_v43 = vld [vmem:[%s1146_s8] sm:$0x1]  ;;  %v807_v58 = vld [vmem:[#allocation10 + $0x30] sm:$0xff]  }
  0x65   :  { %691 = vmatprep.subr.bf16.mxu0 %v958_v0  ;;  %711 = vmatprep.subr.bf16.mxu1 %v958_v0  ;;  %v634_v45 = vld [vmem:[%s1144_s6] ss:$0 sm:$0xff]  ;;  %s605_s6 = sshll.u32 %s961_s4, 4  ;;  %s606_s6 = int_to_ptr.vmem [resolvable:$true] %s605_s6 }
  0x66   :  { %589 = vperm.xlu0 %776, %v586_v43   ;;  %v804_v55 = vld [vmem:[#allocation10 + $0x18] sm:$0xff]   ;;  %s921_s8 = scalar_lea.vmem %s606_s6, 16  ;;  %s925_s12 = scalar_lea.vmem %s606_s6, 32 }
  0x67   :  { %v808_v59 = vld [vmem:[#allocation10 + $0x38] sm:$0xff]   ;;  %p922_p12 = scmp.ne.s32.totalorder %s606_s6, %s921_s8  ;;  %p926_p13 = scmp.lt.s32.totalorder %s606_s6, %s606_s6 }
  0x68   :  { %p927_p0 = scmp.lt.s32.totalorder %s925_s12, %s921_s8 }
  0x6a   :  { %p928_p1 = por %p927_p0, %p926_p13 }
  0x6c   :  { %692 = vmatpush3.bf16.xpose.msra.mxu0 %v779_v4  ;;  %712 = vmatpush3.bf16.xpose.msra.mxu1 %v787_v7  ;;  %p929_p2 = pnand %p928_p1, %p922_p12 }
  0x6d   :  { %693 = vmatprep.subr.bf16.mxu0 %v958_v0  ;;  %713 = vmatprep.subr.bf16.mxu1 %v958_v0 }
  0x74   :  { %694 = vmatpush3.bf16.xpose.msra.mxu0 %v780_v6  ;;  %714 = vmatpush3.bf16.xpose.msra.mxu1 %v788_v9 }
  0x75   :  { %695 = vmatprep.subr.bf16.mxu0 %v958_v0  ;;  %715 = vmatprep.subr.bf16.mxu1 %v958_v0 }
  0x7c   :  { %696 = vmatpush3.bf16.xpose.msra.mxu0 %v781_v8  ;;  %716 = vmatpush3.bf16.xpose.msra.mxu1 %v789_v11 }
  0x7d   :  { %697 = vmatprep.subr.bf16.mxu0 %v958_v0  ;;  %717 = vmatprep.subr.bf16.mxu1 %v958_v0 }
  0x84   :  { %698 = vmatpush3.bf16.xpose.msra.mxu0 %v782_v10  ;;  %718 = vmatpush3.bf16.xpose.msra.mxu1 %v790_v13 }
  0x85   :  { %699 = vmatprep.subr.bf16.mxu0 %v958_v0  ;;  %719 = vmatprep.subr.bf16.mxu1 %v958_v0 }
  0x8c   :  { %700 = vmatpush3.bf16.xpose.msra.mxu0 %v783_v12  ;;  %720 = vmatpush3.bf16.xpose.msra.mxu1 %v791_v16 }
  0x8d   :  { %701 = vmatprep.subr.bf16.mxu0 %v958_v0  ;;  %721 = vmatprep.subr.bf16.mxu1 %v958_v0 }
  0x94   :  { %702 = vmatpush3.bf16.xpose.msra.mxu0 %v784_v14  ;;  %722 = vmatpush3.bf16.xpose.msra.mxu1 %v792_v17 }
  0x95   :  { %727 = vmatprep.subr.bf16.mxu0 %v958_v0 }
  0x9b   :  { %704 = vmatmul.mubr.bf16.vlgmr.msra.gmra.mrb[0].mxu0 %v100_v15 }
  0x9c   :  { %743 = vmatprep.mubr.msk.bf16.mxu0 %vm959_vm0, %v958_v0  ;;  %728 = vmatpush3.bf16.xpose.msra.mxu0 %v793_v18 }
  0x9d   :  { %729 = vmatprep.subr.bf16.mxu0 %v958_v0 }
  0xa4   :  { %730 = vmatpush3.bf16.xpose.msra.mxu0 %v794_v19 }
  0xa5   :  { %731 = vmatprep.subr.bf16.mxu0 %v958_v0 }
  0xac   :  { %732 = vmatpush3.bf16.xpose.msra.mxu0 %v795_v20 }
  0xad   :  { %733 = vmatprep.subr.bf16.mxu0 %v958_v0 }
  0xb4   :  { %734 = vmatpush3.bf16.xpose.msra.mxu0 %v796_v21 }
  0xb5   :  { %735 = vmatprep.subr.bf16.mxu0 %v958_v0 }
  0xbc   :  { %736 = vmatpush3.bf16.xpose.msra.mxu0 %v797_v22 }
  0xbd   :  { %737 = vmatprep.subr.bf16.mxu0 %v958_v0 }
  0xc4   :  { %738 = vmatpush3.bf16.xpose.msra.mxu0 %v798_v23 }
  0xc5   :  { %739 = vmatprep.subr.bf16.mxu0 %v958_v0 }
  0xcc   :  { %740 = vmatpush3.bf16.xpose.msra.mxu0 %v799_v24 }
  0xcd   :  { %741 = vmatprep.subr.bf16.mxu0 %v958_v0 }
  0xd4   :  { %742 = vmatpush3.bf16.xpose.msra.mxu0 %v800_v33 }
  0xe5   :  { %v590_v63 = vpop.permute.xlu0 %589 }
  0xe6   :  { %v595_v0 = vrot.slane %v590_v63, %v594_v62 }
 0x16e   :  { %v206_v26 = vpop.f32.mrb[0].mxu0 }
 0x16f   :  { %v207_v27 = vadd.f32 %v616_v25, %v206_v26  ;;  %v705_v28 = vpop.f32.mrb[1].mxu0 }
 0x170   :  { %v209_v29 = vpop.f32.mrb[2].mxu0 }
 0x171   :  { %809 = vtanh.f32 %v207_v27  ;;  %v706_v30 = vpop.f32.mrb[3].mxu0 }
 0x17b   :  { %v810_v31 = vpop.eup %809 }
 0x17c   :  { %v213_v32 = vpack.c.bf16 %v810_v31, %v810_v31 }
 0x17e   :  { %724 = vmatmul.mubr.bf16.vlgmr.msra.gmra.mrb[0].mxu1 %v213_v32 }
 0x17f   :  { %749 = vmatprep.mubr.bf16.mxu1 %v801_v42 }
 0x251   :  { %v319_v35 = vpop.f32.mrb[0].mxu1 }
 0x252   :  { %v320_v36 = vadd.f32 %v625_v34, %v319_v35  ;;  %v725_v37 = vpop.f32.mrb[1].mxu1 }
 0x253   :  { %v322_v38 = vpop.f32.mrb[2].mxu1 }
 0x254   :  { %v325_v39 = vmax.f32 %v320_v36, 0.0  ;;  %v726_v40 = vpop.f32.mrb[3].mxu1 }
 0x256   :  { %v326_v41 = vpack.c.bf16 %v325_v39, %v325_v39 }
 0x258   :  { %744 = vmatmul.mubr.bf16.vlgmr.msra.gmra.mrb[4].mxu0 %v326_v41 }
 0x32b   :  { %v432_v46 = vpop.f32.mrb[4].mxu0 }
 0x32c   :  { %v433_v47 = vadd.f32 %v634_v45, %v432_v46  ;;  %v745_v48 = vpop.f32.mrb[5].mxu0 }
 0x32d   :  { %v435_v49 = vpop.f32.mrb[6].mxu0 }
 0x32e   :  { %v438_v50 = vmax.f32 %v433_v47, 0.0  ;;  %v746_v51 = vpop.f32.mrb[7].mxu0 }
 0x330   :  { %v439_v52 = vpack.c.bf16 %v438_v50, %v438_v50 }
 0x332   :  { %747 = vmatprep.subr.bf16.mxu1 %v439_v52 }
 0x333   :  { %748 = vmatpush3.bf16.xpose.msra.mxu1 %v439_v52 }
 0x33a   :  { %750 = vmatmul.mubr.bf16.vlgmr.msra.gmra.mrb[4].mxu1 %v802_v53 }
 0x33b   :  { %753 = vmatprep.mubr.bf16.mxu1 %v803_v54 }
 0x342   :  { %754 = vmatmul.mubr.bf16.gmra.mrb[8].mxu1 %v804_v55 }
 0x343   :  { %757 = vmatprep.mubr.bf16.mxu1 %v805_v56 }
 0x34a   :  { %758 = vmatmul.mubr.bf16.gmra.mrb[12].mxu1 %v806_v57 }
 0x34b   :  { %761 = vmatprep.mubr.bf16.mxu1 %v807_v58 }
 0x352   :  { %762 = vmatmul.mubr.bf16.gmra.mrb[16].mxu1 %v808_v59 }
 0x40d   :  { %v751_v1 = vpop.f32.mrb[4].mxu1 }
 0x40e   :  { %v538_v2 = vpop.f32.mrb[5].mxu1 }
 0x40f   :  { %v596_v3 = vadd.f32 %v595_v0, %v538_v2  ;;  %v752_v4 = vpop.f32.mrb[6].mxu1 }
 0x410   :  { %v541_v5 = vpop.f32.mrb[7].mxu1 }
 0x411   :  { %598 = vst.msk [vmem:[#allocation11] sm:$0x1] %vm597_vm1, %v596_v3 }
 0x412   :  { %932 = shalt.err (!%p929_p2)
}
 0x413   :  { %s933_s10 = scalar_lea.hbm %s1147_s9, 16 }
 0x414   :  { %p934_p3 = scmp.ne.s32.totalorder %s1147_s9, %s933_s10  ;;  %p937_p4 = scmp.lt.u32.totalorder %s933_s10, %s1147_s9 }
 0x416   :  { %p939_p5 = pnand %p937_p4, %p934_p3 }
 0x418   :  { %942 = shalt.err (!%p939_p5)
}
 0x419   :  { %608 = dma.vmem_to_hbm [thread:$0]  %s606_s6, 16, %s1147_s9, [#allocation4]   ;;  %v755_v6 = vpop.f32.mrb[8].mxu1 }
 0x41a   :  { %v551_v7 = vpop.f32.mrb[9].mxu1 }
 0x41b   :  { %v756_v8 = vpop.f32.mrb[10].mxu1 }
 0x41c   :  { %v553_v9 = vpop.f32.mrb[11].mxu1 }
 0x41d   :  { %v759_v10 = vpop.f32.mrb[12].mxu1 }
 0x41e   :  { %v563_v11 = vpop.f32.mrb[13].mxu1 }
 0x41f   :  { %v760_v12 = vpop.f32.mrb[14].mxu1 }
 0x420   :  { %v565_v13 = vpop.f32.mrb[15].mxu1 }
 0x425   :  { %v763_v14 = vpop.f32.mrb[16].mxu1 }
 0x426   :  { %v575_v15 = vpop.f32.mrb[17].mxu1 }
 0x427   :  { %v764_v16 = vpop.f32.mrb[18].mxu1 }
 0x428   :  { %v577_v17 = vpop.f32.mrb[19].mxu1 }
 0x429   :  { %949 = dma.done.wait [#allocation4], 16  }
 0x42a   :  { %950 = vsyncadd [#allocation4], 4294967280 }
 0x42b   :  { %612 = vsyncpa [#allocation3], 1 }
 0x42c   :  { %613 = vsyncpa [#allocation6], 1 }
 0x42d   :  { %614 = vsyncpa [#allocation9], 1 }
 0x42e   :  { %615 = vsyncpa [#allocation4], 1 }

</bundles_post_ra>
